<compile_context>
chip_gen: v6e
topology: v6e:2x2x1
jax: 0.10.0
libtpu: 0.0.40
codegen_flags: <defaults>
</compile_context>

<pallas_src>
import functools

import jax
import jax.numpy as jnp
from jax import lax
from jax.experimental import pallas as pl
from jax.experimental.pallas import tpu as pltpu

# ---- model hyperparams (from the PyTorch module) ----
batch_size = 1
input_size = 1
num_hidden = 5
num_layers = 1
seq_length = 9

_HP = 8     # hidden dim padded to 8 lanes (zero padding -> exact semantics)
_OP = 128   # lane-dense output width (full vreg lane width)

# Packed-parameter slab layout, shape (_P_ROWS, _OP) = (24, 128):
#   rows 0.._HP-1        : W_hh^T   (valid block [0:5, 0:5], rest zero)
#   row  _ROW_WIH        : W_ih^T   (valid [0:5], rest zero)   (input_size = 1)
#   row  _ROW_B          : b_ih + b_hh
#   row  _ROW_BOUT       : [b_out, 0, ..., 0]   (bias row for the lane-dense head)
#   rows _ROW_WOUT..+7   : W_out^T as an (Hp, 128) slab (only column 0 nonzero)
_ROW_WIH = _HP
_ROW_B = _HP + 1
_ROW_BOUT = _HP + 2
_ROW_WOUT = 2 * _HP
_P_ROWS = 3 * _HP


def _rnn_kernel(x_ref, p_ref, o_ref, hfin_ref, *, T, Bp):
    # x_ref:    (T*Bp, 1)    time-major input, Bp batch rows per timestep
    # p_ref:    (24, 128)    packed parameters (layout above)
    # o_ref:    (T*Bp, 128)  lane-dense head output (valid result in lane 0)
    # hfin_ref: (Bp, Hp)     final hidden state
    whh_t = p_ref[pl.ds(0, _HP), pl.ds(0, _HP)]        # (Hp, Hp)
    wih = p_ref[pl.ds(_ROW_WIH, 1), pl.ds(0, _HP)]     # (1, Hp)
    b = p_ref[pl.ds(_ROW_B, 1), pl.ds(0, _HP)]         # (1, Hp)
    bout = p_ref[pl.ds(_ROW_BOUT, 1), :]               # (1, 128)
    wout_t = p_ref[pl.ds(_ROW_WOUT, _HP), :]           # (Hp, 128)

    # Input + bias contribution for all timesteps & batch rows — independent of
    # the recurrence, so it sits off the serial chain.
    xw = x_ref[...] * wih + b                          # (T*Bp, Hp)

    # Strictly serial recurrence over T (compile-time constant -> static unroll),
    # batched over Bp sublane rows.  Serial chain per step: dot -> add -> tanh.
    h = jnp.zeros((Bp, _HP), jnp.float32)
    hs = []
    for t in range(T):
        rec = jnp.dot(h, whh_t, preferred_element_type=jnp.float32)  # (Bp, Hp)
        h = jnp.tanh(xw[t * Bp:(t + 1) * Bp, :] + rec)                # (Bp, Hp)
        hs.append(h)

    hfin_ref[...] = h

    # Output head, hoisted out of the recurrence: one MXU dot + one unmasked,
    # lane-dense store covering all timesteps.  Valid result lives in lane 0;
    # all other lanes are exactly zero (wout_t columns 1..127 are zero).
    h_all = jnp.concatenate(hs, axis=0)                # (T*Bp, Hp), stays in vregs
    o_ref[...] = jnp.dot(h_all, wout_t, preferred_element_type=jnp.float32) + bout


def pack_params(params):
    """Pack the five small tensors into one zero-padded (24, 128) fp32 slab.

    Call ONCE at parameter-init/update time (outside the jitted forward); the
    packed slab is what the forward consumes, keeping per-call overhead minimal.
    Zero padding outside the valid 5x5 / 1x5 regions is what keeps the padded
    hidden lanes exactly zero inside the kernel.
    """
    W_ih, W_hh, b_ih, b_hh, W_out, b_out = params
    P = jnp.zeros((_P_ROWS, _OP), jnp.float32)
    P = P.at[:num_hidden, :num_hidden].set(W_hh.T.astype(jnp.float32))
    P = P.at[_ROW_WIH, :num_hidden].set(W_ih.astype(jnp.float32)[:, 0])
    P = P.at[_ROW_B, :num_hidden].set((b_ih + b_hh).astype(jnp.float32))
    P = P.at[_ROW_BOUT, 0].set(b_out.astype(jnp.float32)[0])
    P = P.at[_ROW_WOUT:_ROW_WOUT + num_hidden, 0].set(W_out.astype(jnp.float32)[0, :])
    return P


def _rnnnet_forward(x, packed_params):
    """x: (seq, batch, input) = (T, B, 1); packed_params: (24, 128) from pack_params.
       Returns (o, hidden) like the torch module:
       o: (T, B, 1), hidden: (num_layers, B, num_hidden)."""
    T, B, _ = x.shape
    Bp = max(8, ((B + 7) // 8) * 8)        # batch padded to a sublane multiple

    x2d = x.reshape(T, B).astype(jnp.float32)
    if Bp != B:
        x2d = jnp.pad(x2d, ((0, 0), (0, Bp - B)))
    xcol = x2d.reshape(T * Bp, 1)

    vmem = pl.BlockSpec(memory_space=pltpu.MemorySpace.VMEM)
    o_slab, hfin = pl.pallas_call(
        functools.partial(_rnn_kernel, T=T, Bp=Bp),
        out_shape=(jax.ShapeDtypeStruct((T * Bp, _OP), jnp.float32),
                   jax.ShapeDtypeStruct((Bp, _HP), jnp.float32)),
        in_specs=[vmem, vmem],
        out_specs=(vmem, vmem),
    )(xcol, packed_params)

    o = o_slab[:, 0].reshape(T, Bp, 1)[:, :B, :]
    hidden = hfin[:B, :num_hidden].reshape(num_layers, B, num_hidden)
    return o, hidden


rnnnet_forward = jax.jit(_rnnnet_forward)


def rnnnet_reference(x, params):
    """Pure-JAX reference of the same forward pass (for verification)."""
    W_ih, W_hh, b_ih, b_hh, W_out, b_out = params
    B = x.shape[1]
    h = jnp.zeros((B, num_hidden), jnp.float32)

    def step(h, x_t):
        h_new = jnp.tanh(x_t @ W_ih.T + b_ih + h @ W_hh.T + b_hh)
        o_t = h_new @ W_out.T + b_out
        return h_new, o_t

    h_last, o = lax.scan(step, h, x.astype(jnp.float32))
    return o, h_last[None, ...]


def init_params(key):
    """Deterministic init with PyTorch-style uniform bounds (shapes from __init__)."""
    ks = jax.random.split(key, 6)
    s_rnn = 1.0 / jnp.sqrt(num_hidden)
    s_lin = 1.0 / jnp.sqrt(num_hidden)
    W_ih = jax.random.uniform(ks[0], (num_hidden, input_size), jnp.float32, -s_rnn, s_rnn)
    W_hh = jax.random.uniform(ks[1], (num_hidden, num_hidden), jnp.float32, -s_rnn, s_rnn)
    b_ih = jax.random.uniform(ks[2], (num_hidden,), jnp.float32, -s_rnn, s_rnn)
    b_hh = jax.random.uniform(ks[3], (num_hidden,), jnp.float32, -s_rnn, s_rnn)
    W_out = jax.random.uniform(ks[4], (1, num_hidden), jnp.float32, -s_lin, s_lin)
    b_out = jax.random.uniform(ks[5], (1,), jnp.float32, -s_lin, s_lin)
    return (W_ih, W_hh, b_ih, b_hh, W_out, b_out)


if __name__ == "__main__":
    key = jax.random.PRNGKey(0)
    k_param, k_x, k_xb = jax.random.split(key, 3)
    params = init_params(k_param)
    packed = pack_params(params)  # packed ONCE, outside the jitted per-call path

    # Module-consistent shapes: (seq_length, batch_size, input_size) = (9, 1, 1)
    x = jax.random.uniform(k_x, (seq_length, batch_size, input_size), jnp.float32)
    o, hidden = rnnnet_forward(x, packed)
    o = jax.block_until_ready(o)
    hidden = jax.block_until_ready(hidden)

    o_ref, hidden_ref = rnnnet_reference(x, params)
    assert o.shape == (seq_length, batch_size, 1)
    assert hidden.shape == (num_layers, batch_size, num_hidden)
    assert jnp.allclose(o, o_ref, atol=1e-5, rtol=1e-5)
    assert jnp.allclose(hidden, hidden_ref, atol=1e-5, rtol=1e-5)

    # Batched path (the main perf lever from the review): multiple sequences
    # share the same 9-step serial chain in one kernel call.
    B2 = 4
    xb = jax.random.uniform(k_xb, (seq_length, B2, input_size), jnp.float32)
    ob, hb = rnnnet_forward(xb, packed)
    ob = jax.block_until_ready(ob)
    ob_ref, hb_ref = rnnnet_reference(xb, params)
    assert ob.shape == (seq_length, B2, 1)
    assert hb.shape == (num_layers, B2, num_hidden)
    assert jnp.allclose(ob, ob_ref, atol=1e-5, rtol=1e-5)
    assert jnp.allclose(hb, hb_ref, atol=1e-5, rtol=1e-5)

    # TODO(synk): the module's print_toggle debug prints are intentionally omitted.
    print("KERNEL_OK")
</pallas_src>

<mosaic_0001>
module attributes {stable_mosaic.version = 11 : i64} {
  func.func @_rnn_kernel(%arg0: memref<72x1xf32, #tpu.memory_space<vmem>>, %arg1: memref<24x128xf32, #tpu.memory_space<vmem>>, %arg2: memref<72x128xf32, #tpu.memory_space<vmem>>, %arg3: memref<8x8xf32, #tpu.memory_space<vmem>>) attributes {dimension_semantics = [], scalar_prefetch = 0 : i64, scratch_operands = 0 : i64, tpu.core_type = #tpu.core_type<tc>} {
    %c0 = arith.constant 0 : index
    %c0_0 = arith.constant 0 : index
    %0 = vector.load %arg1[%c0, %c0_0] : memref<24x128xf32, #tpu.memory_space<vmem>>, vector<8x8xf32>
    %c8 = arith.constant 8 : index
    %c0_1 = arith.constant 0 : index
    %1 = vector.load %arg1[%c8, %c0_1] : memref<24x128xf32, #tpu.memory_space<vmem>>, vector<1x8xf32>
    %c9 = arith.constant 9 : index
    %c0_2 = arith.constant 0 : index
    %2 = vector.load %arg1[%c9, %c0_2] : memref<24x128xf32, #tpu.memory_space<vmem>>, vector<1x8xf32>
    %c10 = arith.constant 10 : index
    %c0_3 = arith.constant 0 : index
    %3 = vector.load %arg1[%c10, %c0_3] : memref<24x128xf32, #tpu.memory_space<vmem>>, vector<1x128xf32>
    %c16 = arith.constant 16 : index
    %c0_4 = arith.constant 0 : index
    %4 = vector.load %arg1[%c16, %c0_4] : memref<24x128xf32, #tpu.memory_space<vmem>>, vector<8x128xf32>
    %c0_5 = arith.constant 0 : index
    %c0_6 = arith.constant 0 : index
    %5 = vector.load %arg0[%c0_5, %c0_6] : memref<72x1xf32, #tpu.memory_space<vmem>>, vector<72x1xf32>
    %6 = vector.broadcast %5 : vector<72x1xf32> to vector<72x8xf32>
    %7 = vector.broadcast %1 : vector<1x8xf32> to vector<72x8xf32>
    %8 = arith.mulf %6, %7 : vector<72x8xf32>
    %9 = vector.broadcast %2 : vector<1x8xf32> to vector<72x8xf32>
    %10 = arith.addf %8, %9 : vector<72x8xf32>
    %cst = arith.constant 0.000000e+00 : f32
    %11 = vector.broadcast %cst : f32 to vector<8x8xf32>
    %cst_7 = arith.constant dense<0.000000e+00> : vector<8x8xf32>
    %12 = tpu.matmul %11, %0, %cst_7 {dimension_numbers = #tpu.dot_dimension_numbers<[1], [0], [0], [1], [0, 0, 1, 1], [], []>} : vector<8x8xf32>, vector<8x8xf32>, vector<8x8xf32> -> vector<8x8xf32>
    %13 = vector.extract_strided_slice %10 {offsets = [0, 0], sizes = [8, 8], strides = [1, 1]} : vector<72x8xf32> to vector<8x8xf32>
    %14 = arith.addf %13, %12 : vector<8x8xf32>
    %15 = math.tanh %14 : vector<8x8xf32>
    %cst_8 = arith.constant dense<0.000000e+00> : vector<8x8xf32>
    %16 = tpu.matmul %15, %0, %cst_8 {dimension_numbers = #tpu.dot_dimension_numbers<[1], [0], [0], [1], [0, 0, 1, 1], [], []>} : vector<8x8xf32>, vector<8x8xf32>, vector<8x8xf32> -> vector<8x8xf32>
    %17 = vector.extract_strided_slice %10 {offsets = [8, 0], sizes = [8, 8], strides = [1, 1]} : vector<72x8xf32> to vector<8x8xf32>
    %18 = arith.addf %17, %16 : vector<8x8xf32>
    %19 = math.tanh %18 : vector<8x8xf32>
    %cst_9 = arith.constant dense<0.000000e+00> : vector<8x8xf32>
    %20 = tpu.matmul %19, %0, %cst_9 {dimension_numbers = #tpu.dot_dimension_numbers<[1], [0], [0], [1], [0, 0, 1, 1], [], []>} : vector<8x8xf32>, vector<8x8xf32>, vector<8x8xf32> -> vector<8x8xf32>
    %21 = vector.extract_strided_slice %10 {offsets = [16, 0], sizes = [8, 8], strides = [1, 1]} : vector<72x8xf32> to vector<8x8xf32>
    %22 = arith.addf %21, %20 : vector<8x8xf32>
    %23 = math.tanh %22 : vector<8x8xf32>
    %cst_10 = arith.constant dense<0.000000e+00> : vector<8x8xf32>
    %24 = tpu.matmul %23, %0, %cst_10 {dimension_numbers = #tpu.dot_dimension_numbers<[1], [0], [0], [1], [0, 0, 1, 1], [], []>} : vector<8x8xf32>, vector<8x8xf32>, vector<8x8xf32> -> vector<8x8xf32>
    %25 = vector.extract_strided_slice %10 {offsets = [24, 0], sizes = [8, 8], strides = [1, 1]} : vector<72x8xf32> to vector<8x8xf32>
    %26 = arith.addf %25, %24 : vector<8x8xf32>
    %27 = math.tanh %26 : vector<8x8xf32>
    %cst_11 = arith.constant dense<0.000000e+00> : vector<8x8xf32>
    %28 = tpu.matmul %27, %0, %cst_11 {dimension_numbers = #tpu.dot_dimension_numbers<[1], [0], [0], [1], [0, 0, 1, 1], [], []>} : vector<8x8xf32>, vector<8x8xf32>, vector<8x8xf32> -> vector<8x8xf32>
    %29 = vector.extract_strided_slice %10 {offsets = [32, 0], sizes = [8, 8], strides = [1, 1]} : vector<72x8xf32> to vector<8x8xf32>
    %30 = arith.addf %29, %28 : vector<8x8xf32>
    %31 = math.tanh %30 : vector<8x8xf32>
    %cst_12 = arith.constant dense<0.000000e+00> : vector<8x8xf32>
    %32 = tpu.matmul %31, %0, %cst_12 {dimension_numbers = #tpu.dot_dimension_numbers<[1], [0], [0], [1], [0, 0, 1, 1], [], []>} : vector<8x8xf32>, vector<8x8xf32>, vector<8x8xf32> -> vector<8x8xf32>
    %33 = vector.extract_strided_slice %10 {offsets = [40, 0], sizes = [8, 8], strides = [1, 1]} : vector<72x8xf32> to vector<8x8xf32>
    %34 = arith.addf %33, %32 : vector<8x8xf32>
    %35 = math.tanh %34 : vector<8x8xf32>
    %cst_13 = arith.constant dense<0.000000e+00> : vector<8x8xf32>
    %36 = tpu.matmul %35, %0, %cst_13 {dimension_numbers = #tpu.dot_dimension_numbers<[1], [0], [0], [1], [0, 0, 1, 1], [], []>} : vector<8x8xf32>, vector<8x8xf32>, vector<8x8xf32> -> vector<8x8xf32>
    %37 = vector.extract_strided_slice %10 {offsets = [48, 0], sizes = [8, 8], strides = [1, 1]} : vector<72x8xf32> to vector<8x8xf32>
    %38 = arith.addf %37, %36 : vector<8x8xf32>
    %39 = math.tanh %38 : vector<8x8xf32>
    %cst_14 = arith.constant dense<0.000000e+00> : vector<8x8xf32>
    %40 = tpu.matmul %39, %0, %cst_14 {dimension_numbers = #tpu.dot_dimension_numbers<[1], [0], [0], [1], [0, 0, 1, 1], [], []>} : vector<8x8xf32>, vector<8x8xf32>, vector<8x8xf32> -> vector<8x8xf32>
    %41 = vector.extract_strided_slice %10 {offsets = [56, 0], sizes = [8, 8], strides = [1, 1]} : vector<72x8xf32> to vector<8x8xf32>
    %42 = arith.addf %41, %40 : vector<8x8xf32>
    %43 = math.tanh %42 : vector<8x8xf32>
    %cst_15 = arith.constant dense<0.000000e+00> : vector<8x8xf32>
    %44 = tpu.matmul %43, %0, %cst_15 {dimension_numbers = #tpu.dot_dimension_numbers<[1], [0], [0], [1], [0, 0, 1, 1], [], []>} : vector<8x8xf32>, vector<8x8xf32>, vector<8x8xf32> -> vector<8x8xf32>
    %45 = vector.extract_strided_slice %10 {offsets = [64, 0], sizes = [8, 8], strides = [1, 1]} : vector<72x8xf32> to vector<8x8xf32>
    %46 = arith.addf %45, %44 : vector<8x8xf32>
    %47 = math.tanh %46 : vector<8x8xf32>
    %c0_16 = arith.constant 0 : index
    %c0_17 = arith.constant 0 : index
    %48 = vector.load %arg3[%c0_16, %c0_17] : memref<8x8xf32, #tpu.memory_space<vmem>>, vector<8x8xf32>
    tpu.vector_store %arg3[%c0_16, %c0_17], %47 {strides = array<i32>} : memref<8x8xf32, #tpu.memory_space<vmem>>, vector<8x8xf32>,
    %49 = tpu.concatenate %15, %19, %23, %27, %31, %35, %39, %43, %47 in 0 : vector<8x8xf32>, vector<8x8xf32>, vector<8x8xf32>, vector<8x8xf32>, vector<8x8xf32>, vector<8x8xf32>, vector<8x8xf32>, vector<8x8xf32>, vector<8x8xf32> -> vector<72x8xf32>
    %cst_18 = arith.constant dense<0.000000e+00> : vector<72x128xf32>
    %50 = tpu.matmul %49, %4, %cst_18 {dimension_numbers = #tpu.dot_dimension_numbers<[1], [0], [0], [1], [0, 0, 1, 1], [], []>} : vector<72x8xf32>, vector<8x128xf32>, vector<72x128xf32> -> vector<72x128xf32>
    %51 = vector.broadcast %3 : vector<1x128xf32> to vector<72x128xf32>
    %52 = arith.addf %50, %51 : vector<72x128xf32>
    %c0_19 = arith.constant 0 : index
    %c0_20 = arith.constant 0 : index
    %53 = vector.load %arg2[%c0_19, %c0_20] : memref<72x128xf32, #tpu.memory_space<vmem>>, vector<72x128xf32>
    tpu.vector_store %arg2[%c0_19, %c0_20], %52 {strides = array<i32>} : memref<72x128xf32, #tpu.memory_space<vmem>>, vector<72x128xf32>,
    return
  }
}

</mosaic_0001>

<bundles_post_ra>
// kernel: squeeze.1
= control target key start
LH: loop header
LB: loop body
LE: loop exit
PB: predicated region body
PF: predicated region fallthrough
CT: control target
= control target key end

     0   :  { %s75_s8 = smov 120   ;;  %vm8_vm0 = vcmask 64512   ;;  %s76_s11 = smov 96   ;;  %s131_s0 = inlined_call_operand.vmem [shape: f32[72], index: 0, kind: input, shape index: {}]   ;;  %s132_s1 = inlined_call_operand.vmem [shape: f32[9,8,1], index: 1, kind: output, shape index: {}]  }
   0x1   :  { %v5_v0 = vld [vmem:[%s131_s0] sm:$0x1]  ;;  %s74_s0 = smov 104   ;;  %s77_s12 = smov 112  }
   0x2   :  { %6 = vst [vmem:[#allocation0] sm:$0x1] %v5_v0  ;;  %s78_s13 = smov 80   ;;  %s79_s14 = smov 88  }
   0x3   :  { %s80_s15 = smov 64   ;;  %s81_s16 = smov 72  }
   0x9   :  { %v22_v1 = vld [vmem:[#allocation0] sm:$0x1]  }
   0xa   :  { %v10_v2 = vld [vmem:[#allocation0] sm:$0x1]   ;;  %23 = vrot.lane.b32.xlu1 %v22_v1, %s74_s0 }
   0xb   :  { %11 = vrot.lane.b32.xlu0 %v10_v2, %s75_s8  ;;  %v28_v3 = vld [vmem:[#allocation0] sm:$0x1]  }
   0xc   :  { %v16_v4 = vld [vmem:[#allocation0] sm:$0x1]  }
   0xd   :  { %v7_v5 = vld [vmem:[#allocation0] sm:$0x1]  }
   0xe   :  { %9 = vst.msk [vmem:[%s132_s1] sm:$0x1] %vm8_vm0, %v7_v5   ;;  %29 = vrot.lane.b32.xlu1 %v28_v3, %s76_s11  ;;  %v40_v6 = vld [vmem:[#allocation0] sm:$0x1]  }
   0xf   :  { %17 = vrot.lane.b32.xlu0 %v16_v4, %s77_s12  ;;  %v34_v7 = vld [vmem:[#allocation0] sm:$0x1]  }
  0x10   :  { %v52_v8 = vld [vmem:[#allocation0] sm:$0x1]  }
  0x11   :  { %v46_v9 = vld [vmem:[#allocation0] sm:$0x1]  }
  0x12   :  { %41 = vrot.lane.b32.xlu1 %v40_v6, %s78_s13 }
  0x13   :  { %35 = vrot.lane.b32.xlu0 %v34_v7, %s79_s14 }
  0x16   :  { %53 = vrot.lane.b32.xlu1 %v52_v8, %s80_s15 }
  0x17   :  { %47 = vrot.lane.b32.xlu0 %v46_v9, %s81_s16 }
  0x7c   :  { %v24_v10 = vpop.permute.xlu1 %23  }
  0x7d   :  { %v12_v11 = vpop.permute.xlu0 %11   ;;  %60 = vst.msk [vmem:[%s132_s1 + $0x3] sm:$0x1] %vm8_vm0, %v24_v10  }
  0x7e   :  { %58 = vst.msk [vmem:[%s132_s1 + $0x1] sm:$0x1] %vm8_vm0, %v12_v11  }
  0x80   :  { %v30_v12 = vpop.permute.xlu1 %29  }
  0x81   :  { %v18_v13 = vpop.permute.xlu0 %17   ;;  %61 = vst.msk [vmem:[%s132_s1 + $0x4] sm:$0x1] %vm8_vm0, %v30_v12  }
  0x82   :  { %59 = vst.msk [vmem:[%s132_s1 + $0x2] sm:$0x1] %vm8_vm0, %v18_v13  }
  0x84   :  { %v42_v14 = vpop.permute.xlu1 %41  }
  0x85   :  { %v36_v15 = vpop.permute.xlu0 %35   ;;  %63 = vst.msk [vmem:[%s132_s1 + $0x6] sm:$0x1] %vm8_vm0, %v42_v14  }
  0x86   :  { %62 = vst.msk [vmem:[%s132_s1 + $0x5] sm:$0x1] %vm8_vm0, %v36_v15  }
  0x88   :  { %v54_v16 = vpop.permute.xlu1 %53  }
  0x89   :  { %v48_v17 = vpop.permute.xlu0 %47   ;;  %65 = vst.msk [vmem:[%s132_s1 + $0x8] sm:$0x1] %vm8_vm0, %v54_v16  }
  0x8a   :  { %64 = vst.msk [vmem:[%s132_s1 + $0x7] sm:$0x1] %vm8_vm0, %v48_v17  }

// kernel: _rnnnet_forward.1
= control target key start
LH: loop header
LB: loop body
LE: loop exit
PB: predicated region body
PF: predicated region fallthrough
CT: control target
= control target key end

     0   :  { %v1056_v0 = vmov 0.0   ;;  %vm1057_vm0 = vmmov 0   ;;  %v1058_v3 = vmov 0   ;;  %vm98_vm1 = vcmask 64512   ;;  %s1266_s1 = inlined_call_operand.vmem [shape: f32[24,128], index: 1, kind: input, shape index: {}]   ;;  %s1267_s0 = inlined_call_operand.vmem [shape: f32[72,1], index: 0, kind: input, shape index: {}]   ;;  %s1268_s2 = inlined_call_operand.vmem [shape: f32[72,128], index: 2, kind: output, shape index: {0}]   ;;  %s1269_s3 = inlined_call_operand.vmem [shape: f32[8,8], index: 3, kind: output, shape index: {1}]  }
   0x1   :  { %957 = vmatprep.subr.mxu0 %v1056_v0  ;;  %v1083_v1 = vld [vmem:[%s1266_s1] sm:$0xff]  ;;  %959 = vmatprep.mubr.msk.f32.mxu0 %vm1057_vm0, %v1056_v0  ;;  %v19_v4 = vld [vmem:[%s1267_s0 + $0x8] sm:$0xff]  ;;  %v24_v6 = vld [vmem:[%s1267_s0 + $0x30] sm:$0xff] }
   0x2   :  { %v18_v2 = vld [vmem:[%s1267_s0] sm:$0xff]  ;;  %958 = vmatpush3.msra.mxu0 %v1083_v1  ;;  %1036 = vset.pattern.permute.xlu0 %v1058_v3  ;;  %v1117_v8 = vld [vmem:[%s1266_s1 + $0x8] ss:$0 sm:$0xff]  ;;  %v1123_v11 = vld [vmem:[%s1266_s1 + $0x9] ss:$0 sm:$0xff] }
   0x3   :  { %960 = vmatmul.mubr.f32.vlgmr.msra.gmra.mxu0 %v1056_v0  ;;  %29 = vperm.xlu0 %1036, %v18_v2   ;;  %v22_v5 = vld [vmem:[%s1267_s0 + $0x20] sm:$0xff]  ;;  %v20_v17 = vld [vmem:[%s1267_s0 + $0x10] sm:$0xff]  ;;  %v21_v18 = vld [vmem:[%s1267_s0 + $0x18] sm:$0xff] }
   0x4   :  { %962 = vmatprep.subr.mxu1 %v1056_v0  ;;  %964 = vmatprep.mubr.msk.f32.mxu1 %vm1057_vm0, %v1056_v0  ;;  %v26_v7 = vld [vmem:[%s1267_s0 + $0x40] sm:$0xff]  ;;  %v23_v19 = vld [vmem:[%s1267_s0 + $0x28] sm:$0xff]  ;;  %v25_v20 = vld [vmem:[%s1267_s0 + $0x38] sm:$0xff] }
   0x5   :  { %963 = vmatpush3.msra.mxu1 %v1083_v1  ;;  %967 = vmatprep.subr.mxu0 %v1056_v0  ;;  %v17_v62 = vld [vmem:[%s1266_s1 + $0x10] sm:$0xff] }
   0x6   :  { %968 = vmatpush3.msra.mxu0 %v1083_v1  ;;  %969 = vmatprep.mubr.msk.f32.mxu0 %vm1057_vm0, %v1056_v0 }
   0x7   :  { %34 = vperm.xlu0 %1036, %v19_v4   ;;  %1037 = vset.pattern.permute.xlu1 %v1058_v3 }
   0x8   :  { %972 = vmatprep.subr.mxu1 %v1056_v0  ;;  %977 = vmatprep.subr.mxu0 %v1056_v0 }
   0x9   :  { %39 = vperm.xlu1 %1037, %v20_v17  }
   0xb   :  { %49 = vperm.xlu0 %1036, %v22_v5  }
   0xd   :  { %44 = vperm.xlu1 %1037, %v21_v18  }
   0xf   :  { %59 = vperm.xlu0 %1036, %v24_v6  }
  0x11   :  { %54 = vperm.xlu1 %1037, %v23_v19  }
  0x13   :  { %69 = vperm.xlu0 %1036, %v26_v7   ;;  %v919_v7 = vld [vmem:[%s1266_s1 + $0xa] ss:$0 sm:$0xff] }
  0x15   :  { %64 = vperm.xlu1 %1037, %v25_v20  }
  0x7e   :  { %v30_v9 = vpop.permute.xlu0 %29 }
  0x7f   :  { %v76_v10 = vmul.f32 %v1117_v8, %v30_v9 }
  0x81   :  { %v89_v12 = vadd.f32 %v1123_v11, %v76_v10 }
  0x82   :  { %v35_v21 = vpop.permute.xlu0 %34 }
  0x83   :  { %v77_v22 = vmul.f32 %v1117_v8, %v35_v21 }
  0x84   :  { %v40_v28 = vpop.permute.xlu1 %39 }
  0x85   :  { %v90_v23 = vadd.f32 %v1123_v11, %v77_v22  ;;  %v78_v29 = vmul.f32 %v1117_v8, %v40_v28 }
  0x86   :  { %v50_v42 = vpop.permute.xlu0 %49 }
  0x87   :  { %v91_v30 = vadd.f32 %v1123_v11, %v78_v29  ;;  %v80_v43 = vmul.f32 %v1117_v8, %v50_v42 }
  0x88   :  { %v45_v35 = vpop.permute.xlu1 %44 }
  0x89   :  { %v79_v36 = vmul.f32 %v1117_v8, %v45_v35  ;;  %v93_v44 = vadd.f32 %v1123_v11, %v80_v43 }
  0x8a   :  { %v60_v56 = vpop.permute.xlu0 %59 }
  0x8b   :  { %v92_v37 = vadd.f32 %v1123_v11, %v79_v36  ;;  %v82_v57 = vmul.f32 %v1117_v8, %v60_v56 }
  0x8c   :  { %v55_v49 = vpop.permute.xlu1 %54 }
  0x8d   :  { %v81_v50 = vmul.f32 %v1117_v8, %v55_v49  ;;  %v95_v58 = vadd.f32 %v1123_v11, %v82_v57 }
  0x8e   :  { %v70_v21 = vpop.permute.xlu0 %69 }
  0x8f   :  { %v94_v51 = vadd.f32 %v1123_v11, %v81_v50 }
  0xc3   :  { %v168_v13 = vpop.f32.mrf.mxu0 }
  0xc4   :  { %v172_v14 = vadd.f32 %v168_v13, %v89_v12 }
  0xc5   :  { %v961_v15 = vpop.f32.mrf.mxu0 }
  0xc6   :  { %1038 = vtanh.f32 %v172_v14 }
  0xd3   :  { %v1126_v16 = vpop.eup %1038 }
  0xd4   :  { %965 = vmatmul.mubr.msk.f32.vlgmr.msra.gmra.mxu1 %vm98_vm1, %v1126_v16 }
  0xd5   :  { %973 = vmatpush3.msra.mxu1 %v1083_v1  ;;  %974 = vmatprep.mubr.msk.f32.mxu1 %vm1057_vm0, %v1056_v0 }
  0xd6   :  { %982 = vmatprep.subr.mxu1 %v1056_v0 }
 0x194   :  { %v243_v24 = vpop.f32.mrf.mxu1 }
 0x195   :  { %v247_v25 = vadd.f32 %v243_v24, %v90_v23 }
 0x196   :  { %v966_v26 = vpop.f32.mrf.mxu1 }
 0x197   :  { %1040 = vtanh.f32 %v247_v25 }
 0x1a4   :  { %v1148_v27 = vpop.eup %1040 }
 0x1a5   :  { %970 = vmatmul.mubr.msk.f32.vlgmr.msra.gmra.mxu0 %vm98_vm1, %v1148_v27 }
 0x1a6   :  { %978 = vmatpush3.msra.mxu0 %v1083_v1  ;;  %979 = vmatprep.mubr.msk.f32.mxu0 %vm1057_vm0, %v1056_v0 }
 0x1a7   :  { %987 = vmatprep.subr.mxu0 %v1056_v0 }
 0x265   :  { %v318_v31 = vpop.f32.mrf.mxu0 }
 0x266   :  { %v322_v32 = vadd.f32 %v318_v31, %v91_v30 }
 0x267   :  { %v971_v33 = vpop.f32.mrf.mxu0 }
 0x268   :  { %1042 = vtanh.f32 %v322_v32 }
 0x275   :  { %v1158_v34 = vpop.eup %1042 }
 0x276   :  { %975 = vmatmul.mubr.msk.f32.vlgmr.msra.gmra.mxu1 %vm98_vm1, %v1158_v34 }
 0x277   :  { %983 = vmatpush3.msra.mxu1 %v1083_v1  ;;  %984 = vmatprep.mubr.msk.f32.mxu1 %vm1057_vm0, %v1056_v0 }
 0x278   :  { %992 = vmatprep.subr.mxu1 %v1056_v0 }
 0x336   :  { %v393_v38 = vpop.f32.mrf.mxu1 }
 0x337   :  { %v397_v39 = vadd.f32 %v393_v38, %v92_v37 }
 0x338   :  { %v976_v40 = vpop.f32.mrf.mxu1 }
 0x339   :  { %1044 = vtanh.f32 %v397_v39 }
 0x346   :  { %v1168_v41 = vpop.eup %1044 }
 0x347   :  { %980 = vmatmul.mubr.msk.f32.vlgmr.msra.gmra.mxu0 %vm98_vm1, %v1168_v41 }
 0x348   :  { %988 = vmatpush3.msra.mxu0 %v1083_v1  ;;  %989 = vmatprep.mubr.msk.f32.mxu0 %vm1057_vm0, %v1056_v0 }
 0x349   :  { %997 = vmatprep.subr.mxu0 %v1056_v0 }
 0x407   :  { %v468_v45 = vpop.f32.mrf.mxu0 }
 0x408   :  { %v472_v46 = vadd.f32 %v468_v45, %v93_v44 }
 0x409   :  { %v981_v47 = vpop.f32.mrf.mxu0 }
 0x40a   :  { %1046 = vtanh.f32 %v472_v46 }
 0x417   :  { %v1047_v48 = vpop.eup %1046 }
 0x418   :  { %985 = vmatmul.mubr.msk.f32.vlgmr.msra.gmra.mxu1 %vm98_vm1, %v1047_v48 }
 0x419   :  { %993 = vmatpush3.msra.mxu1 %v1083_v1  ;;  %994 = vmatprep.mubr.msk.f32.mxu1 %vm1057_vm0, %v1056_v0 }
 0x41a   :  { %1031 = vmatprep.subr.mxu1 %v1056_v0 }
 0x4d8   :  { %v543_v52 = vpop.f32.mrf.mxu1 }
 0x4d9   :  { %v547_v53 = vadd.f32 %v543_v52, %v94_v51 }
 0x4da   :  { %v986_v54 = vpop.f32.mrf.mxu1 }
 0x4db   :  { %1048 = vtanh.f32 %v547_v53 }
 0x4e8   :  { %v1049_v55 = vpop.eup %1048 }
 0x4e9   :  { %990 = vmatmul.mubr.msk.f32.vlgmr.msra.gmra.mxu0 %vm98_vm1, %v1049_v55 }
 0x4ea   :  { %998 = vmatpush3.msra.mxu0 %v1083_v1  ;;  %999 = vmatprep.mubr.msk.f32.mxu0 %vm1057_vm0, %v1056_v0  ;;  %v65_v1 = vpop.permute.xlu1 %64 }
 0x4eb   :  { %1002 = vmatprep.subr.mxu0 %v1056_v0  ;;  %v83_v2 = vmul.f32 %v1117_v8, %v65_v1 }
 0x4ed   :  { %v96_v3 = vadd.f32 %v1123_v11, %v83_v2 }
 0x5a9   :  { %v618_v59 = vpop.f32.mrf.mxu0 }
 0x5aa   :  { %v622_v60 = vadd.f32 %v618_v59, %v95_v58 }
 0x5ab   :  { %v991_v61 = vpop.f32.mrf.mxu0 }
 0x5ac   :  { %1050 = vtanh.f32 %v622_v60 }
 0x5b9   :  { %v1051_v63 = vpop.eup %1050 }
 0x5ba   :  { %995 = vmatmul.mubr.msk.f32.vlgmr.msra.gmra.mxu1 %vm98_vm1, %v1051_v63 }
 0x5bb   :  { %1032 = vmatpush3.msra.mxu1 %v17_v62  ;;  %1016 = vmatprep.mubr.msk.f32.mxu1 %vm1057_vm0, %v1056_v0 }
 0x5be   :  { %1017 = vmatmul.mubr.msk.f32.vlgmr.msra.gmra.mxu1 %vm98_vm1, %v1047_v48 }
 0x5bf   :  { %1019 = vmatprep.mubr.msk.f32.mxu1 %vm1057_vm0, %v1056_v0 }
 0x5c2   :  { %1020 = vmatmul.mubr.msk.f32.gmra.mxu1 %vm98_vm1, %v1049_v55 }
 0x5c3   :  { %1022 = vmatprep.mubr.msk.f32.mxu1 %vm1057_vm0, %v1056_v0 }
 0x5c6   :  { %1023 = vmatmul.mubr.msk.f32.gmra.mxu1 %vm98_vm1, %v1051_v63 }
 0x5c7   :  { %1025 = vmatprep.mubr.msk.f32.mxu1 %vm1057_vm0, %v1056_v0 }
 0x67a   :  { %v693_v4 = vpop.f32.mrf.mxu1 }
 0x67b   :  { %v697_v5 = vadd.f32 %v693_v4, %v96_v3 }
 0x67c   :  { %v996_v6 = vpop.f32.mrf.mxu1 }
 0x67d   :  { %1052 = vtanh.f32 %v697_v5 }
 0x67e   :  { %v868_v9 = vpop.f32.mrf.mxu1 }
 0x67f   :  { %v869_v10 = vadd.f32 %v919_v7, %v868_v9 }
 0x680   :  { %v1018_v12 = vpop.f32.mrf.mxu1 }
 0x681   :  { %896 = vst [vmem:[%s1268_s2 + $0x20] sm:$0xff] %v869_v10 }
 0x682   :  { %v873_v13 = vpop.f32.mrf.mxu1 }
 0x683   :  { %v874_v14 = vadd.f32 %v919_v7, %v873_v13 }
 0x684   :  { %v1021_v15 = vpop.f32.mrf.mxu1 }
 0x685   :  { %897 = vst [vmem:[%s1268_s2 + $0x28] sm:$0xff] %v874_v14 }
 0x686   :  { %v878_v17 = vpop.f32.mrf.mxu1 }
 0x687   :  { %v879_v18 = vadd.f32 %v919_v7, %v878_v17 }
 0x688   :  { %v1024_v19 = vpop.f32.mrf.mxu1 }
 0x689   :  { %898 = vst [vmem:[%s1268_s2 + $0x30] sm:$0xff] %v879_v18 }
 0x68a   :  { %v1053_v20 = vpop.eup %1052 }
 0x68b   :  { %1000 = vmatmul.mubr.msk.f32.vlgmr.msra.gmra.mxu0 %vm98_vm1, %v1053_v20  ;;  %1026 = vmatmul.mubr.msk.f32.gmra.mxu1 %vm98_vm1, %v1053_v20 }
 0x68c   :  { %1003 = vmatpush3.msra.mxu0 %v17_v62  ;;  %1004 = vmatprep.mubr.msk.f32.mxu0 %vm1057_vm0, %v1056_v0 }
 0x68d   :  { %1028 = vmatprep.mubr.msk.f32.mxu1 %vm1057_vm0, %v1056_v0 }
 0x68f   :  { %1005 = vmatmul.mubr.msk.f32.vlgmr.msra.gmra.mxu0 %vm98_vm1, %v1126_v16  ;;  %v84_v16 = vmul.f32 %v1117_v8, %v70_v21 }
 0x690   :  { %1007 = vmatprep.mubr.msk.f32.mxu0 %vm1057_vm0, %v1056_v0 }
 0x691   :  { %v97_v22 = vadd.f32 %v1123_v11, %v84_v16 }
 0x693   :  { %1008 = vmatmul.mubr.msk.f32.gmra.mxu0 %vm98_vm1, %v1148_v27 }
 0x694   :  { %1010 = vmatprep.mubr.msk.f32.mxu0 %vm1057_vm0, %v1056_v0 }
 0x697   :  { %1011 = vmatmul.mubr.msk.f32.gmra.mxu0 %vm98_vm1, %v1158_v34 }
 0x698   :  { %1013 = vmatprep.mubr.msk.f32.mxu0 %vm1057_vm0, %v1056_v0 }
 0x69b   :  { %1014 = vmatmul.mubr.msk.f32.gmra.mxu0 %vm98_vm1, %v1168_v41 }
 0x74b   :  { %v768_v23 = vpop.f32.mrf.mxu0  ;;  %v883_v24 = vpop.f32.mrf.mxu1 }
 0x74c   :  { %v772_v25 = vadd.f32 %v768_v23, %v97_v22  ;;  %v884_v26 = vadd.f32 %v919_v7, %v883_v24 }
 0x74d   :  { %v1001_v27 = vpop.f32.mrf.mxu0  ;;  %v1027_v28 = vpop.f32.mrf.mxu1 }
 0x74e   :  { %1054 = vtanh.f32 %v772_v25  ;;  %899 = vst [vmem:[%s1268_s2 + $0x38] sm:$0xff] %v884_v26 }
 0x74f   :  { %v848_v0 = vpop.f32.mrf.mxu0 }
 0x750   :  { %v849_v29 = vadd.f32 %v919_v7, %v848_v0 }
 0x751   :  { %v1006_v30 = vpop.f32.mrf.mxu0 }
 0x752   :  { %892 = vst [vmem:[%s1268_s2] sm:$0xff] %v849_v29 }
 0x753   :  { %v853_v8 = vpop.f32.mrf.mxu0 }
 0x754   :  { %v854_v11 = vadd.f32 %v919_v7, %v853_v8 }
 0x755   :  { %v1009_v31 = vpop.f32.mrf.mxu0 }
 0x756   :  { %893 = vst [vmem:[%s1268_s2 + $0x8] sm:$0xff] %v854_v11 }
 0x757   :  { %v858_v32 = vpop.f32.mrf.mxu0 }
 0x758   :  { %v859_v33 = vadd.f32 %v919_v7, %v858_v32 }
 0x759   :  { %v1012_v34 = vpop.f32.mrf.mxu0 }
 0x75a   :  { %894 = vst [vmem:[%s1268_s2 + $0x10] sm:$0xff] %v859_v33 }
 0x75b   :  { %v1055_v35 = vpop.eup %1054  ;;  %v863_v36 = vpop.f32.mrf.mxu0 }
 0x75c   :  { %774 = vst.msk [vmem:[%s1269_s3] sm:$0xff] %vm98_vm1, %v1055_v35  ;;  %v864_v37 = vadd.f32 %v919_v7, %v863_v36  ;;  %1029 = vmatmul.mubr.msk.f32.gmra.mxu1 %vm98_vm1, %v1055_v35 }
 0x75d   :  { %v1015_v38 = vpop.f32.mrf.mxu0 }
 0x75e   :  { %895 = vst [vmem:[%s1268_s2 + $0x18] sm:$0xff] %v864_v37 }
 0x81c   :  { %v888_v39 = vpop.f32.mrf.mxu1 }
 0x81d   :  { %v889_v40 = vadd.f32 %v919_v7, %v888_v39 }
 0x81e   :  { %v1030_v41 = vpop.f32.mrf.mxu1 }
 0x81f   :  { %900 = vst [vmem:[%s1268_s2 + $0x40] sm:$0xff] %v889_v40 }

</bundles_post_ra>
